<compile_context>
chip_gen: v7x
topology: tpu7x:2x2x1
jax: 0.10.0
libtpu: 0.0.40
codegen_flags: <defaults>
</compile_context>

<pallas_src>
import functools

import jax
import jax.numpy as jnp
from jax.experimental import pallas as pl
from jax.experimental.pallas import tpu as pltpu

LEAKY_SLOPE = 0.2
BN_EPS = 0.001


# --------------------------------------------------------------------------- #
# VMEM budget (generation-aware)
# --------------------------------------------------------------------------- #
def _vmem_budget_bytes():
    """~70% of physical VMEM (v5e/v6e: 128 MiB -> ~90 MiB, v7x: 64 MiB -> ~45 MiB)."""
    cap = None
    try:
        info_fn = getattr(pltpu, "get_tpu_info", None)
        if info_fn is not None:
            cap = getattr(info_fn(), "vmem_capacity_bytes", None)
    except Exception:
        cap = None
    if not cap:
        cap = 64 * 1024 * 1024  # conservative default = v7x physical VMEM
    return int(cap * 0.7)


# --------------------------------------------------------------------------- #
# Kernels
# --------------------------------------------------------------------------- #
def _epilogue(acc, p):
    """bias + LeakyReLU(0.2) + BatchNorm1d (biased batch stats), all in f32.

    p is the packed (3, tn) parameter block: rows = [bias, gamma, beta].
    Dropout: identity (inference behaviour).
    """
    y = acc + p[0:1, :]
    y = jnp.maximum(y, LEAKY_SLOPE * y)                 # LeakyReLU, one VALU op
    n_inv = 1.0 / y.shape[0]
    mean = jnp.sum(y, axis=0, keepdims=True) * n_inv
    ex2 = jnp.sum(y * y, axis=0, keepdims=True) * n_inv
    var = ex2 - mean * mean                             # fused single-pass stats
    inv_std = jax.lax.rsqrt(var + BN_EPS)
    return p[1:2, :] * ((y - mean) * inv_std) + p[2:3, :]


def _kernel_full_k(x_ref, w_ref, p_ref, o_ref):
    """grid=(Op//tn,): one full-K matmul per output-feature tile + epilogue."""
    acc = jnp.dot(x_ref[...], w_ref[...], preferred_element_type=jnp.float32)
    o_ref[...] = _epilogue(acc, p_ref[...]).astype(o_ref.dtype)


def _kernel_k_tiled(x_ref, w_ref, p_ref, o_ref):
    """grid=(Op//tn, F//tk): accumulate matmul over K directly into the f32
    output block (resident across the K axis), finalize on the last K step."""
    k = pl.program_id(1)

    @pl.when(k == 0)
    def _():
        o_ref[...] = jnp.zeros_like(o_ref)

    o_ref[...] += jnp.dot(x_ref[...], w_ref[...], preferred_element_type=jnp.float32)

    @pl.when(k == pl.num_programs(1) - 1)
    def _():
        o_ref[...] = _epilogue(o_ref[...], p_ref[...]).astype(o_ref.dtype)


# --------------------------------------------------------------------------- #
# pallas_call wrappers
# --------------------------------------------------------------------------- #
def _call_full_k(x2d, w, params, tn, vmem_limit):
    N, Fp = x2d.shape
    Op = w.shape[1]
    return pl.pallas_call(
        _kernel_full_k,
        out_shape=jax.ShapeDtypeStruct((N, Op), jnp.float32),
        grid_spec=pltpu.PrefetchScalarGridSpec(
            num_scalar_prefetch=0,
            grid=(Op // tn,),
            in_specs=[
                pl.BlockSpec((N, Fp), lambda j: (0, 0)),
                pl.BlockSpec((Fp, tn), lambda j: (0, j)),
                pl.BlockSpec((3, tn), lambda j: (0, j)),
            ],
            out_specs=pl.BlockSpec((N, tn), lambda j: (0, j)),
        ),
        compiler_params=pltpu.CompilerParams(
            dimension_semantics=("parallel",),
            vmem_limit_bytes=vmem_limit,
        ),
    )(x2d, w, params)


def _call_k_tiled(x2d, w, params, tn, tk, vmem_limit):
    N, Fp = x2d.shape
    Op = w.shape[1]
    # TODO(synk): for large N the (N, tn) resident output block plus whole-batch BN
    # would need N-tiling with a two-pass sum / sum-of-squares structure (per-feature
    # partial stats make that legal without changing BN semantics).
    return pl.pallas_call(
        _kernel_k_tiled,
        out_shape=jax.ShapeDtypeStruct((N, Op), jnp.float32),
        grid_spec=pltpu.PrefetchScalarGridSpec(
            num_scalar_prefetch=0,
            grid=(Op // tn, Fp // tk),
            in_specs=[
                pl.BlockSpec((N, tk), lambda j, k: (0, k)),
                pl.BlockSpec((tk, tn), lambda j, k: (k, j)),
                pl.BlockSpec((3, tn), lambda j, k: (0, j)),
            ],
            out_specs=pl.BlockSpec((N, tn), lambda j, k: (0, j)),
        ),
        compiler_params=pltpu.CompilerParams(
            dimension_semantics=("parallel", "arbitrary"),
            vmem_limit_bytes=vmem_limit,
        ),
    )(x2d, w, params)


# --------------------------------------------------------------------------- #
# One-time parameter prep (hoisted out of the per-call path)
# --------------------------------------------------------------------------- #
def prepare_dense_block_params(weight, bias, gamma, beta, channels, height, width,
                               compute_dtype=jnp.bfloat16):
    """Run ONCE at parameter-load time.

    * Folds the NCHW->NHWC flatten permutation into the weight rows so x can be
      flattened in native NCHW order (free reshape, no transpose at call time).
    * Pads in_features and out_features up to multiples of 128 (lane-dense blocks,
      unmasked vst; padded columns stay exactly zero through the whole epilogue).
    * Packs bias/gamma/beta into a single (3, Op) f32 array (one DMA, not three).
    * Casts the weight to the MXU compute dtype (bf16 by default).
    """
    F, O = weight.shape
    assert F == channels * height * width
    w_nchw = (weight.reshape(height, width, channels, O)
              .transpose(2, 0, 1, 3).reshape(F, O))
    Fp = max(128, pl.cdiv(F, 128) * 128)
    Op = max(128, pl.cdiv(O, 128) * 128)
    w_p = jnp.pad(w_nchw, ((0, Fp - F), (0, Op - O))).astype(compute_dtype)
    params = jnp.stack([
        jnp.pad(bias, (0, Op - O)),
        jnp.pad(gamma, (0, Op - O), constant_values=1.0),
        jnp.pad(beta, (0, Op - O)),
    ]).astype(jnp.float32)
    return w_p, params


# --------------------------------------------------------------------------- #
# Per-call wrapper
# --------------------------------------------------------------------------- #
@functools.partial(jax.jit,
                   static_argnames=("out_features", "force_path", "tk", "vmem_budget"))
def dense_block_apply(x_nchw, w_prepped, params_packed, *, out_features,
                      force_path=None, tk=None, vmem_budget=None):
    """x_nchw: (N, C, H, W) f32; w_prepped/params_packed from prepare_dense_block_params."""
    N, C, H, W = x_nchw.shape
    F = C * H * W
    Fp, Op = w_prepped.shape
    compute_dtype = w_prepped.dtype

    # Free NCHW flatten (permutation already folded into the weight) + MXU cast.
    x2d = x_nchw.reshape(N, F).astype(compute_dtype)
    if Fp != F:
        x2d = jnp.pad(x2d, ((0, 0), (0, Fp - F)))

    budget = vmem_budget if vmem_budget is not None else _vmem_budget_bytes()

    # Output-feature tile (BN stats are per-feature -> every Op tile is independent).
    tn = 256 if (Op % 256 == 0 and Op > 256) else 128
    tn = min(tn, Op)

    in_bytes = jnp.dtype(compute_dtype).itemsize
    # Footprint of the full-K path including Pallas default double buffering (x2).
    full_k_bytes = 2 * (N * Fp * in_bytes + Fp * tn * in_bytes + 3 * tn * 4 + N * tn * 4)
    use_full_k = full_k_bytes <= budget
    if force_path == "full_k":
        use_full_k = True
    elif force_path == "k_tiled":
        use_full_k = False

    vmem_limit = int(budget)
    if use_full_k:
        out_p = _call_full_k(x2d, w_prepped, params_packed, tn, vmem_limit)
    else:
        if tk is None:
            tk = 512 if Fp % 512 == 0 else (256 if Fp % 256 == 0 else 128)
        assert Fp % tk == 0
        out_p = _call_k_tiled(x2d, w_prepped, params_packed, tn, tk, vmem_limit)

    return out_p[:, :out_features]


# --------------------------------------------------------------------------- #
# References (pure JAX, torch semantics)
# --------------------------------------------------------------------------- #
def _reference_epilogue(y, bias, gamma, beta):
    y = y + bias
    y = jnp.where(y >= 0, y, LEAKY_SLOPE * y)
    mean = y.mean(axis=0, keepdims=True)
    var = y.var(axis=0, keepdims=True)            # biased, like torch BN normalization
    return gamma * (y - mean) * jax.lax.rsqrt(var + BN_EPS) + beta


def dense_block_reference(x_nchw, weight, bias, gamma, beta):
    N = x_nchw.shape[0]
    x2d = jnp.transpose(x_nchw, (0, 2, 3, 1)).reshape(N, -1)   # NHWC flatten
    return _reference_epilogue(x2d @ weight, bias, gamma, beta)


if __name__ == "__main__":
    # Small shapes consistent with the module: NCHW input, in_features = H*W*C.
    N, C, H, W = 8, 4, 8, 8                  # in_features = 256
    O = 32                                   # out_features
    F = C * H * W

    key = jax.random.PRNGKey(0)
    kx, kw, kb = jax.random.split(key, 3)
    x = jax.random.normal(kx, (N, C, H, W), dtype=jnp.float32)
    weight = jax.random.normal(kw, (F, O), dtype=jnp.float32) / jnp.sqrt(F)
    bias = jax.random.normal(kb, (O,), dtype=jnp.float32) * 0.01
    gamma = jnp.ones((O,), dtype=jnp.float32)    # torch BatchNorm1d defaults
    beta = jnp.zeros((O,), dtype=jnp.float32)

    # One-time parameter prep (hoisted out of the per-call path).
    w_prepped, params_packed = prepare_dense_block_params(weight, bias, gamma, beta, C, H, W)
    w_prepped = jax.block_until_ready(w_prepped)

    # f32 reference (torch semantics) and a bf16-quantized reference (same math the
    # kernel performs: bf16 operands, f32 accumulation) for a tight orchestration check.
    ref_f32 = dense_block_reference(x, weight, bias, gamma, beta)
    xq = x.reshape(N, F).astype(jnp.bfloat16).astype(jnp.float32)
    wq = w_prepped.astype(jnp.float32)[:F, :O]
    ref_q = _reference_epilogue(xq @ wq, bias, gamma, beta)

    # Fast path: full-K, output-feature-tiled (fits comfortably in VMEM here).
    out = dense_block_apply(x, w_prepped, params_packed, out_features=O)
    out = jax.block_until_ready(out)
    assert out.shape == (N, O)
    assert jnp.allclose(out, ref_q, atol=2e-3, rtol=2e-3), "full-K path vs quantized ref"
    assert jnp.allclose(out, ref_f32, atol=5e-2, rtol=5e-2), "full-K path vs f32 ref"

    # Also exercise the K-tiled fallback (forced; two K steps of 128).
    out_t = dense_block_apply(x, w_prepped, params_packed, out_features=O,
                              force_path="k_tiled", tk=128)
    out_t = jax.block_until_ready(out_t)
    assert jnp.allclose(out_t, ref_q, atol=2e-3, rtol=2e-3), "K-tiled path vs quantized ref"
    assert jnp.allclose(out_t, out, atol=1e-3, rtol=1e-3), "paths disagree"

    print("KERNEL_OK")
</pallas_src>

<mosaic_0001>
module attributes {stable_mosaic.version = 11 : i64} {
  func.func @_kernel_full_k(%arg0: i32, %arg1: memref<8x256xbf16, #tpu.memory_space<vmem>>, %arg2: memref<256x128xbf16, #tpu.memory_space<vmem>>, %arg3: memref<3x128xf32, #tpu.memory_space<vmem>>, %arg4: memref<8x128xf32, #tpu.memory_space<vmem>>) attributes {dimension_semantics = [#tpu.dimension_semantics<parallel>], iteration_bounds = array<i64: 1>, scalar_prefetch = 0 : i64, scratch_operands = 0 : i64, tpu.core_type = #tpu.core_type<tc>, window_params = [{pipeline_mode = #tpu.pipeline_mode<synchronous>, transform_indices = @transform_0, window_bounds = array<i64: 8, 256>}, {transform_indices = @transform_1, window_bounds = array<i64: 256, 128>}, {transform_indices = @transform_2, window_bounds = array<i64: 3, 128>}, {transform_indices = @transform_3, window_bounds = array<i64: 8, 128>}]} {
    %c0 = arith.constant 0 : index
    %c0_0 = arith.constant 0 : index
    %0 = vector.load %arg1[%c0, %c0_0] : memref<8x256xbf16, #tpu.memory_space<vmem>>, vector<8x256xbf16>
    %c0_1 = arith.constant 0 : index
    %c0_2 = arith.constant 0 : index
    %1 = vector.load %arg2[%c0_1, %c0_2] : memref<256x128xbf16, #tpu.memory_space<vmem>>, vector<256x128xbf16>
    %cst = arith.constant dense<0.000000e+00> : vector<8x128xf32>
    %2 = tpu.matmul %0, %1, %cst {dimension_numbers = #tpu.dot_dimension_numbers<[1], [0], [0], [1], [0, 0, 1, 1], [], []>} : vector<8x256xbf16>, vector<256x128xbf16>, vector<8x128xf32> -> vector<8x128xf32>
    %c0_3 = arith.constant 0 : index
    %c0_4 = arith.constant 0 : index
    %3 = vector.load %arg3[%c0_3, %c0_4] : memref<3x128xf32, #tpu.memory_space<vmem>>, vector<3x128xf32>
    %4 = vector.extract_strided_slice %3 {offsets = [0, 0], sizes = [1, 128], strides = [1, 1]} : vector<3x128xf32> to vector<1x128xf32>
    %5 = vector.broadcast %4 : vector<1x128xf32> to vector<8x128xf32>
    %6 = arith.addf %2, %5 : vector<8x128xf32>
    %cst_5 = arith.constant 2.000000e-01 : f32
    %7 = vector.broadcast %cst_5 : f32 to vector<8x128xf32>
    %8 = arith.mulf %7, %6 : vector<8x128xf32>
    %9 = arith.maximumf %6, %8 : vector<8x128xf32>
    %cst_6 = arith.constant dense<0.000000e+00> : vector<128xf32>
    %10 = vector.multi_reduction <add>, %9, %cst_6 [0] : vector<8x128xf32> to vector<128xf32>
    %11 = vector.shape_cast %10 : vector<128xf32> to vector<1x128xf32>
    %cst_7 = arith.constant 1.250000e-01 : f32
    %12 = vector.broadcast %cst_7 : f32 to vector<1x128xf32>
    %13 = arith.mulf %11, %12 : vector<1x128xf32>
    %14 = arith.mulf %9, %9 : vector<8x128xf32>
    %cst_8 = arith.constant dense<0.000000e+00> : vector<128xf32>
    %15 = vector.multi_reduction <add>, %14, %cst_8 [0] : vector<8x128xf32> to vector<128xf32>
    %16 = vector.shape_cast %15 : vector<128xf32> to vector<1x128xf32>
    %cst_9 = arith.constant 1.250000e-01 : f32
    %17 = vector.broadcast %cst_9 : f32 to vector<1x128xf32>
    %18 = arith.mulf %16, %17 : vector<1x128xf32>
    %19 = arith.mulf %13, %13 : vector<1x128xf32>
    %20 = arith.subf %18, %19 : vector<1x128xf32>
    %cst_10 = arith.constant 1.000000e-03 : f32
    %21 = vector.broadcast %cst_10 : f32 to vector<1x128xf32>
    %22 = arith.addf %20, %21 : vector<1x128xf32>
    %23 = math.rsqrt %22 : vector<1x128xf32>
    %24 = vector.extract_strided_slice %3 {offsets = [1, 0], sizes = [1, 128], strides = [1, 1]} : vector<3x128xf32> to vector<1x128xf32>
    %25 = vector.broadcast %13 : vector<1x128xf32> to vector<8x128xf32>
    %26 = arith.subf %9, %25 : vector<8x128xf32>
    %27 = vector.broadcast %23 : vector<1x128xf32> to vector<8x128xf32>
    %28 = arith.mulf %26, %27 : vector<8x128xf32>
    %29 = vector.broadcast %24 : vector<1x128xf32> to vector<8x128xf32>
    %30 = arith.mulf %29, %28 : vector<8x128xf32>
    %31 = vector.extract_strided_slice %3 {offsets = [2, 0], sizes = [1, 128], strides = [1, 1]} : vector<3x128xf32> to vector<1x128xf32>
    %32 = vector.broadcast %31 : vector<1x128xf32> to vector<8x128xf32>
    %33 = arith.addf %30, %32 : vector<8x128xf32>
    %c0_11 = arith.constant 0 : index
    %c0_12 = arith.constant 0 : index
    %34 = vector.load %arg4[%c0_11, %c0_12] : memref<8x128xf32, #tpu.memory_space<vmem>>, vector<8x128xf32>
    tpu.vector_store %arg4[%c0_11, %c0_12], %33 {strides = array<i32>} : memref<8x128xf32, #tpu.memory_space<vmem>>, vector<8x128xf32>,
    return
  }
  func.func @transform_0(%arg0: i32) -> (i32, i32) {
    %c0_i32 = arith.constant 0 : i32
    %c0_i32_0 = arith.constant 0 : i32
    %c0_i32_1 = arith.constant 0 : i32
    return %c0_i32, %c0_i32_0 : i32, i32
  }
  func.func @transform_1(%arg0: i32) -> (i32, i32) {
    %c0_i32 = arith.constant 0 : i32
    %c0_i32_0 = arith.constant 0 : i32
    return %c0_i32, %arg0 : i32, i32
  }
  func.func @transform_2(%arg0: i32) -> (i32, i32) {
    %c0_i32 = arith.constant 0 : i32
    %c0_i32_0 = arith.constant 0 : i32
    return %c0_i32, %arg0 : i32, i32
  }
  func.func @transform_3(%arg0: i32) -> (i32, i32) {
    %c0_i32 = arith.constant 0 : i32
    %c0_i32_0 = arith.constant 0 : i32
    return %c0_i32, %arg0 : i32, i32
  }
}

</mosaic_0001>

<bundles_post_ra>
// kernel: dense_block_apply.1
= control target key start
LH: loop header
LB: loop body
LE: loop exit
PB: predicated region body
PF: predicated region fallthrough
CT: control target
= control target key end

     0   :  { %s417_s0 = inlined_call_operand.vmem [shape: bf16[8,256], index: 0, kind: input, shape index: {}]   ;;  %s418_s1 = inlined_call_operand.vmem [shape: bf16[256,128], index: 1, kind: input, shape index: {}]   ;;  %s419_s2 = inlined_call_operand.vmem [shape: f32[3,128], index: 2, kind: input, shape index: {}]   ;;  %s420_s3 = inlined_call_operand.hbm [shape: f32[8,128], index: 3, kind: output, shape index: {}]  }
   0x1   :  { %v286_v0 = vld [vmem:[%s418_s1 + $0x40] sm:$0xff]   ;;  %v288_v2 = vld [vmem:[%s418_s1 + $0x48] sm:$0xff]   ;;  %v290_v4 = vld [vmem:[%s418_s1 + $0x50] sm:$0xff]  }
   0x2   :  { %v287_v1 = vld [vmem:[%s418_s1] sm:$0xff]   ;;  %263 = vmatprep.subr.bf16.mxu0 %v286_v0  ;;  %v289_v3 = vld [vmem:[%s418_s1 + $0x8] sm:$0xff]   ;;  %v291_v5 = vld [vmem:[%s418_s1 + $0x10] sm:$0xff]  }
   0x3   :  { %264 = vmatpush3.bf16.msra.mxu0 %v287_v1  ;;  %v292_v6 = vld [vmem:[%s418_s1 + $0x58] sm:$0xff]   ;;  %v294_v8 = vld [vmem:[%s418_s1 + $0x60] sm:$0xff]   ;;  %v296_v10 = vld [vmem:[%s418_s1 + $0x68] sm:$0xff]  }
   0x4   :  { %265 = vmatprep.subr.bf16.mxu0 %v288_v2  ;;  %v293_v7 = vld [vmem:[%s418_s1 + $0x18] sm:$0xff]   ;;  %v295_v9 = vld [vmem:[%s418_s1 + $0x20] sm:$0xff]  }
   0x5   :  { %v16_v11 = vld [vmem:[%s417_s0] sm:$0xff] }
   0x7   :  { %266 = vmatpush3.bf16.msra.mxu0 %v289_v3 }
   0x8   :  { %267 = vmatprep.subr.bf16.mxu0 %v290_v4 }
   0xb   :  { %268 = vmatpush3.bf16.msra.mxu0 %v291_v5 }
   0xc   :  { %269 = vmatprep.subr.bf16.mxu0 %v292_v6 }
   0xf   :  { %270 = vmatpush3.bf16.msra.mxu0 %v293_v7 }
  0x10   :  { %271 = vmatprep.subr.bf16.mxu0 %v294_v8 }
  0x11   :  { %8 = vsyncpa [#allocation3], 0  ;;  %v246_v12 = vcombine.high %v16_v11, %v16_v11  ;;  %v297_v13 = vld [vmem:[%s418_s1 + $0x28] sm:$0xff]   ;;  %v298_v14 = vld [vmem:[%s418_s1 + $0x70] sm:$0xff]   ;;  %v245_v18 = vcombine.low %v16_v11, %v16_v11  ;;  %v50_v19 = vlaneseq }
  0x12   :  { %v299_v15 = vld [vmem:[%s418_s1 + $0x30] sm:$0xff]   ;;  %v300_v16 = vld [vmem:[%s418_s1 + $0x78] sm:$0xff]   ;;  %v49_v22 = vld [vmem:[%s419_s2] sm:$0x7] }
  0x13   :  { %272 = vmatpush3.bf16.msra.mxu0 %v295_v9  ;;  %189 = vmatprep.mubr.bf16.mxu0 %v246_v12  ;;  %v301_v17 = vld [vmem:[%s418_s1 + $0x38] sm:$0xff]   ;;  %v51_v20 = vshrl.u32 %v50_v19, 7  ;;  %s330_s1 = smov [#allocation2]  }
  0x14   :  { %273 = vmatprep.subr.bf16.mxu0 %v296_v10  ;;  %s237_s2 = sshll.u32 %s330_s1, 4  ;;  %s238_s2 = int_to_ptr.vmem [resolvable:$true] %s237_s2 }
  0x15   :  { %v52_v21 = vsub.s32 0, %v51_v20  ;;  %v222_v50 = vsub.s32 1, %v51_v20  ;;  %v227_v51 = vsub.s32 2, %v51_v20  ;;  %s306_s20 = scalar_lea.vmem %s238_s2, 128  ;;  %p311_p1 = scmp.lt.s32.totalorder %s238_s2, %s238_s2 }
  0x16   :  { %p307_p0 = scmp.ne.s32.totalorder %s238_s2, %s306_s20  ;;  %p312_p2 = scmp.lt.s32.totalorder %s306_s20, %s306_s20 }
  0x17   :  { %274 = vmatpush3.bf16.msra.mxu0 %v297_v13  ;;  %v53_v24 = vrot.slane %v49_v22, %v52_v21  ;;  %v223_v53 = vrot.slane %v49_v22, %v222_v50  ;;  %v228_v56 = vrot.slane %v49_v22, %v227_v51 }
  0x18   :  { %275 = vmatprep.subr.bf16.mxu0 %v298_v14  ;;  %p313_p3 = por %p312_p2, %p311_p1 }
  0x1a   :  { %p314_p4 = pnand %p313_p3, %p307_p0 }
  0x1b   :  { %276 = vmatpush3.bf16.msra.mxu0 %v299_v15 }
  0x1c   :  { %277 = vmatprep.subr.bf16.mxu0 %v300_v16 }
  0x1f   :  { %278 = vmatpush3.bf16.msra.mxu0 %v301_v17 }
  0x22   :  { %190 = vmatmul.mubr.bf16.vlgmr.msra.gmra.mrb[0].mxu0 %v245_v18 }
  0xf5   :  { %v279_v23 = vpop.f32.mrb[0].mxu0 }
  0xf6   :  { %v280_v25 = vpop.f32.mrb[1].mxu0 }
  0xf7   :  { %v281_v26 = vadd.f32 %v280_v25, %v279_v23  ;;  %v282_v27 = vpop.f32.mrb[2].mxu0 }
  0xf8   :  { %v283_v28 = vpop.f32.mrb[3].mxu0 }
  0xf9   :  { %v192_v29 = vadd.f32 %v281_v26, %v53_v24 }
  0xfb   :  { %v197_v30 = vmul.f32 0.2, %v192_v29 }
  0xfd   :  { %v198_v31 = vmax.f32 %v192_v29, %v197_v30 }
  0xff   :  { %v199_v32 = vrot.slane %v198_v31, 4  ;;  %v206_v33 = vmul.f32 %v198_v31, %v198_v31 }
 0x101   :  { %v200_v34 = vadd.f32 %v199_v32, %v198_v31  ;;  %v207_v35 = vrot.slane %v206_v33, 4 }
 0x103   :  { %v201_v36 = vrot.slane %v200_v34, 2  ;;  %v208_v37 = vadd.f32 %v207_v35, %v206_v33 }
 0x105   :  { %v209_v38 = vrot.slane %v208_v37, 2  ;;  %v202_v39 = vadd.f32 %v201_v36, %v200_v34 }
 0x107   :  { %v210_v40 = vadd.f32 %v209_v38, %v208_v37  ;;  %v203_v41 = vrot.slane %v202_v39, 1 }
 0x109   :  { %v211_v42 = vrot.slane %v210_v40, 1  ;;  %v204_v43 = vadd.f32 %v203_v41, %v202_v39 }
 0x10b   :  { %v205_v44 = vmul.f32 0.125, %v204_v43  ;;  %v212_v45 = vadd.f32 %v211_v42, %v210_v40 }
 0x10d   :  { %v213_v46 = vmul.f32 0.125, %v212_v45  ;;  %v214_v47 = vmul.f32 %v205_v44, %v205_v44  ;;  %v218_v52 = vsub.f32 %v198_v31, %v205_v44 }
 0x10f   :  { %v215_v48 = vsub.f32 %v213_v46, %v214_v47 }
 0x111   :  { %v216_v49 = vadd.f32 0.001, %v215_v48 }
 0x113   :  { %304 = vrsqrt.f32 %v216_v49 }
 0x11d   :  { %v305_v54 = vpop.eup %304 }
 0x11e   :  { %v219_v55 = vmul.f32 %v305_v54, %v218_v52 }
 0x120   :  { %v224_v57 = vmul.f32 %v223_v53, %v219_v55 }
 0x122   :  { %v229_v58 = vadd.f32 %v228_v56, %v224_v57 }
 0x124   :  { %230 = vst [vmem:[#allocation2] sm:$0xff] %v229_v58 }
 0x125   :  { %317 = shalt.err (!%p314_p4)
}
 0x126   :  { %s318_s23 = scalar_lea.hbm %s420_s3, 128 }
 0x127   :  { %p319_p5 = scmp.ne.s32.totalorder %s420_s3, %s318_s23  ;;  %p322_p6 = scmp.lt.u32.totalorder %s318_s23, %s420_s3 }
 0x129   :  { %p324_p7 = pnand %p322_p6, %p319_p5 }
 0x12b   :  { %327 = shalt.err (!%p324_p7)
}
 0x12c   :  { %240 = dma.vmem_to_hbm [thread:$0]  %s238_s2, 128, %s420_s3, [#allocation3]  }
 0x12d   :  { %328 = dma.done.wait [#allocation3], 128  }
 0x12e   :  { %329 = vsyncadd [#allocation3], 4294967168 }
 0x12f   :  { %244 = vsyncpa [#allocation3], 1 }

</bundles_post_ra>
